<compile_context>
chip_gen: v7x
topology: tpu7x:2x2x1
jax: 0.10.0
libtpu: 0.0.40
codegen_flags: <defaults>
</compile_context>

<pallas_src>
import jax
import jax.numpy as jnp
from jax.experimental import pallas as pl
from jax.experimental.pallas import tpu as pltpu


def _round_up(x, m):
    return ((x + m - 1) // m) * m


def _make_qmixture_kernel(M):
    """Kernel over a (TN, E*E) row-slab per modality + a (TN, M) weight block."""
    def kernel(*refs):
        # refs = (x_0, ..., x_{M-1}, w_ref, o_ref)
        x_refs = refs[:M]
        w_ref = refs[M]
        o_ref = refs[M + 1]
        w = w_ref[...].astype(jnp.float32)                     # (TN, M)
        acc = x_refs[0][...].astype(jnp.float32) * w[:, 0:1]   # (TN, EE)
        for m in range(1, M):                                  # M static, unrolled
            acc = acc + x_refs[m][...].astype(jnp.float32) * w[:, m:m + 1]
        o_ref[...] = acc.astype(o_ref.dtype)
    return kernel


def qmixture_mix(x_list, w, tn=1024):
    """x_list: M arrays of shape (N, EE); w: (N, M) -> (N, EE).

    out[n, :] = sum_m x_list[m][n, :] * w[n, m]
    """
    M = len(x_list)
    N, EE = x_list[0].shape
    out_dtype = x_list[0].dtype

    # Tile rows: multiple of 8 (sublane), capped by requested tn.
    TN = min(tn, _round_up(N, 8))
    N_pad = _round_up(N, TN)
    if N_pad != N:
        pad = N_pad - N
        x_list = [jnp.pad(x, ((0, pad), (0, 0))) for x in x_list]
        w = jnp.pad(w, ((0, pad), (0, 0)))

    grid = (N_pad // TN,)
    out = pl.pallas_call(
        _make_qmixture_kernel(M),
        out_shape=jax.ShapeDtypeStruct((N_pad, EE), out_dtype),
        grid=grid,
        in_specs=(
            [pl.BlockSpec((TN, EE), lambda n: (n, 0)) for _ in range(M)]
            + [pl.BlockSpec((TN, M), lambda n: (n, 0))]
        ),
        out_specs=pl.BlockSpec((TN, EE), lambda n: (n, 0)),
        compiler_params=pltpu.CompilerParams(
            dimension_semantics=("parallel",)),
    )(*x_list, w)
    return out[:N]


def qmixture_forward(in_modalities, weights, tn=1024):
    """Pallas equivalent of QMixture.forward (use_weights=True path)."""
    M = len(in_modalities)
    T = len(in_modalities[0])
    F = len(in_modalities[0][0])
    B, E, _ = in_modalities[0][0][0].shape
    N = T * F * B
    EE = E * E

    # Per-modality slabs: (T, F, B, E, E) -> (N, EE). No stack along M.
    # TODO(synk): have the upstream producer emit these slabs directly to avoid
    # the per-modality stacking pass over HBM entirely.
    x_list = []
    for m in range(M):
        x_m = jnp.stack(
            [jnp.stack([in_modalities[m][t][f] for f in range(F)], axis=0)
             for t in range(T)], axis=0)                       # (T, F, B, E, E)
        x_list.append(x_m.reshape(N, EE))

    # weights (B, T, M) -> per-(t, f, b) rows of length M.
    w_t = jnp.transpose(weights, (1, 0, 2))                    # (T, B, M)
    w_all = jnp.broadcast_to(w_t[:, None, :, :], (T, F, B, M))  # (T, F, B, M)
    w_flat = w_all.reshape(N, M)

    out_flat = qmixture_mix(x_list, w_flat, tn=tn)             # (N, EE)
    out = out_flat.reshape(T, F, B, E, E)
    return [[out[t, f] for f in range(F)] for t in range(T)]


def qmixture_ref(in_modalities, weights):
    """Pure-JAX reference mirroring the PyTorch loop."""
    M = len(in_modalities)
    T = len(in_modalities[0])
    F = len(in_modalities[0][0])
    outputs = []
    for t in range(T):
        fields = []
        for f in range(F):
            stacked = jnp.stack([in_modalities[m][t][f] for m in range(M)],
                                axis=-1)                       # (B, E, E, M)
            w = weights[:, t, :]                               # (B, M)
            fields.append(jnp.einsum('bijm,bm->bij', stacked, w))
        outputs.append(fields)
    return outputs


if __name__ == "__main__":
    B, T, M, F, E = 2, 4, 2, 2, 16   # batch, time, modalities, fields, embed dim

    key = jax.random.PRNGKey(0)
    keys = jax.random.split(key, M * T * F + 1)

    # in_modalities[m][t][f] : (B, E, E)
    in_modalities = []
    k_idx = 0
    for m in range(M):
        t_list = []
        for t in range(T):
            f_list = []
            for f in range(F):
                f_list.append(jax.random.normal(keys[k_idx], (B, E, E),
                                                dtype=jnp.float32))
                k_idx += 1
            t_list.append(f_list)
        in_modalities.append(t_list)

    # weights : (B, T, M), normalized over modalities like a mixture.
    raw_w = jax.random.uniform(keys[-1], (B, T, M), dtype=jnp.float32)
    weights = raw_w / jnp.sum(raw_w, axis=-1, keepdims=True)

    out = qmixture_forward(in_modalities, weights)
    out = jax.block_until_ready(out)

    ref = qmixture_ref(in_modalities, weights)
    for t in range(T):
        for f in range(F):
            assert out[t][f].shape == (B, E, E)
            assert jnp.allclose(out[t][f], ref[t][f], atol=1e-5, rtol=1e-5), \
                f"mismatch at t={t}, f={f}"

    print("KERNEL_OK")
</pallas_src>

<mosaic_0001>
module attributes {stable_mosaic.version = 11 : i64} {
  func.func @kernel(%arg0: i32, %arg1: memref<16x256xf32, #tpu.memory_space<vmem>>, %arg2: memref<16x256xf32, #tpu.memory_space<vmem>>, %arg3: memref<16x2xf32, #tpu.memory_space<vmem>>, %arg4: memref<16x256xf32, #tpu.memory_space<vmem>>) attributes {dimension_semantics = [#tpu.dimension_semantics<parallel>], iteration_bounds = array<i64: 1>, scalar_prefetch = 0 : i64, scratch_operands = 0 : i64, tpu.core_type = #tpu.core_type<tc>, window_params = [{transform_indices = @transform_0, window_bounds = array<i64: 16, 256>}, {transform_indices = @transform_1, window_bounds = array<i64: 16, 256>}, {transform_indices = @transform_2, window_bounds = array<i64: 16, 2>}, {transform_indices = @transform_3, window_bounds = array<i64: 16, 256>}]} {
    %c0 = arith.constant 0 : index
    %c0_0 = arith.constant 0 : index
    %0 = vector.load %arg3[%c0, %c0_0] : memref<16x2xf32, #tpu.memory_space<vmem>>, vector<16x2xf32>
    %c0_1 = arith.constant 0 : index
    %c0_2 = arith.constant 0 : index
    %1 = vector.load %arg1[%c0_1, %c0_2] : memref<16x256xf32, #tpu.memory_space<vmem>>, vector<16x256xf32>
    %2 = vector.extract_strided_slice %0 {offsets = [0, 0], sizes = [16, 1], strides = [1, 1]} : vector<16x2xf32> to vector<16x1xf32>
    %3 = vector.broadcast %2 : vector<16x1xf32> to vector<16x256xf32>
    %4 = arith.mulf %1, %3 : vector<16x256xf32>
    %c0_3 = arith.constant 0 : index
    %c0_4 = arith.constant 0 : index
    %5 = vector.load %arg2[%c0_3, %c0_4] : memref<16x256xf32, #tpu.memory_space<vmem>>, vector<16x256xf32>
    %6 = vector.extract_strided_slice %0 {offsets = [0, 1], sizes = [16, 1], strides = [1, 1]} : vector<16x2xf32> to vector<16x1xf32>
    %7 = vector.broadcast %6 : vector<16x1xf32> to vector<16x256xf32>
    %8 = arith.mulf %5, %7 : vector<16x256xf32>
    %9 = arith.addf %4, %8 : vector<16x256xf32>
    %c0_5 = arith.constant 0 : index
    %c0_6 = arith.constant 0 : index
    %10 = vector.load %arg4[%c0_5, %c0_6] : memref<16x256xf32, #tpu.memory_space<vmem>>, vector<16x256xf32>
    tpu.vector_store %arg4[%c0_5, %c0_6], %9 {strides = array<i32>} : memref<16x256xf32, #tpu.memory_space<vmem>>, vector<16x256xf32>,
    return
  }
  func.func @transform_0(%arg0: i32) -> (i32, i32) {
    %c0_i32 = arith.constant 0 : i32
    %c0_i32_0 = arith.constant 0 : i32
    return %arg0, %c0_i32 : i32, i32
  }
  func.func @transform_1(%arg0: i32) -> (i32, i32) {
    %c0_i32 = arith.constant 0 : i32
    %c0_i32_0 = arith.constant 0 : i32
    return %arg0, %c0_i32 : i32, i32
  }
  func.func @transform_2(%arg0: i32) -> (i32, i32) {
    %c0_i32 = arith.constant 0 : i32
    %c0_i32_0 = arith.constant 0 : i32
    return %arg0, %c0_i32 : i32, i32
  }
  func.func @transform_3(%arg0: i32) -> (i32, i32) {
    %c0_i32 = arith.constant 0 : i32
    %c0_i32_0 = arith.constant 0 : i32
    return %arg0, %c0_i32 : i32, i32
  }
}

</mosaic_0001>

<bundles_post_ra>
// kernel: tpu_custom_call.1
= control target key start
LH: loop header
LB: loop body
LE: loop exit
PB: predicated region body
PF: predicated region fallthrough
CT: control target
= control target key end

     0   :  { %8 = vsyncpa [#allocation3], 0  ;;  %s265_s0 = inlined_call_operand.hbm [shape: f32[16,256], index: 0, kind: input, shape index: {}]   ;;  %s266_s1 = inlined_call_operand.hbm [shape: f32[16,256], index: 1, kind: input, shape index: {}]   ;;  %s267_s2 = inlined_call_operand.vmem [shape: f32[16,2], index: 2, kind: input, shape index: {}]   ;;  %s268_s3 = inlined_call_operand.hbm [shape: f32[16,256], index: 3, kind: output, shape index: {}]  }
   0x1   :  { %9 = vsyncpa [#allocation6], 0 }
   0x2   :  { %10 = vsyncpa [#allocation4], 0  ;;  %s187_s12 = smov [#allocation2]   ;;  %s115_s16 = scalar_lea.hbm %s265_s0, 512 }
   0x3   :  { %s16_s13 = sshll.u32 %s187_s12, 4  ;;  %p116_p0 = scmp.ne.s32.totalorder %s265_s0, %s115_s16  ;;  %s17_s13 = int_to_ptr.vmem [resolvable:$true] %s16_s13 }
   0x4   :  { %p119_p1 = scmp.lt.u32.totalorder %s115_s16, %s265_s0 }
   0x6   :  { %p121_p2 = pnand %p119_p1, %p116_p0 }
   0x8   :  { %124 = shalt.err (!%p121_p2)
}
   0x9   :  { %s125_s21 = scalar_lea.vmem %s17_s13, 512  ;;  %p130_p4 = scmp.lt.s32.totalorder %s17_s13, %s17_s13 }
   0xa   :  { %p126_p3 = scmp.ne.s32.totalorder %s17_s13, %s125_s21  ;;  %p131_p5 = scmp.lt.s32.totalorder %s125_s21, %s125_s21 }
   0xc   :  { %p132_p6 = por %p131_p5, %p130_p4 }
   0xe   :  { %p133_p7 = pnand %p132_p6, %p126_p3 }
  0x10   :  { %136 = shalt.err (!%p133_p7)
}
  0x11   :  { %s188_s22 = smov 256   ;;  %s189_s23 = smov 16  }
  0x12   :  { %22 = dma.hbm_to_vmem [thread:$0]  %s265_s0, 512, %s17_s13, [#allocation3], %s188_s22, %s188_s22, %s189_s23  }
  0x13   :  { %s190_s26 = smov [#allocation5]   ;;  %s137_s30 = scalar_lea.hbm %s266_s1, 512 }
  0x14   :  { %s28_s27 = sshll.u32 %s190_s26, 4  ;;  %p138_p8 = scmp.ne.s32.totalorder %s266_s1, %s137_s30  ;;  %s29_s27 = int_to_ptr.vmem [resolvable:$true] %s28_s27 }
  0x15   :  { %p141_p9 = scmp.lt.u32.totalorder %s137_s30, %s266_s1 }
  0x17   :  { %p143_p10 = pnand %p141_p9, %p138_p8 }
  0x19   :  { %146 = shalt.err (!%p143_p10)
}
  0x1a   :  { %s147_s8 = scalar_lea.vmem %s29_s27, 512  ;;  %p152_p12 = scmp.lt.s32.totalorder %s29_s27, %s29_s27 }
  0x1b   :  { %p148_p11 = scmp.ne.s32.totalorder %s29_s27, %s147_s8  ;;  %p153_p13 = scmp.lt.s32.totalorder %s147_s8, %s147_s8 }
  0x1d   :  { %p154_p0 = por %p153_p13, %p152_p12 }
  0x1f   :  { %p155_p1 = pnand %p154_p0, %p148_p11 }
  0x21   :  { %158 = shalt.err (!%p155_p1)
}
  0x22   :  { %34 = dma.hbm_to_vmem [thread:$0]  %s266_s1, 512, %s29_s27, [#allocation6], %s188_s22, %s188_s22, %s189_s23  }
  0x23   :  { %181 = dma.done.wait [#allocation3], 512  }
  0x24   :  { %182 = vsyncadd [#allocation3], 4294966784 }
  0x25   :  { %183 = dma.done.wait [#allocation6], 512  }
  0x26   :  { %184 = vsyncadd [#allocation6], 4294966784  ;;  %v191_v0 = vmov 1   ;;  %v192_v1 = vmov 0   ;;  %v43_v2 = vld [vmem:[%s267_s2] sm:$0xff]  ;;  %v44_v3 = vld [vmem:[%s267_s2 + $0x8] sm:$0xff] }
  0x27   :  { %113 = vset.pattern.permute.xlu1 %v191_v0  ;;  %112 = vset.pattern.permute.xlu0 %v192_v1  ;;  %v63_v4 = vld [vmem:[#allocation5] sm:$0xff]  ;;  %v64_v5 = vld [vmem:[#allocation5 + $0x8] sm:$0xff]  ;;  %v65_v14 = vld [vmem:[#allocation5 + $0x10] sm:$0xff]  ;;  %s193_s1 = smov [#allocation7]  }
  0x28   :  { %68 = vperm.xlu1 %113, %v43_v2   ;;  %51 = vperm.xlu0 %112, %v43_v2   ;;  %v45_v6 = vld [vmem:[#allocation2] sm:$0xff]  ;;  %v46_v7 = vld [vmem:[#allocation2 + $0x8] sm:$0xff]  ;;  %v66_v15 = vld [vmem:[#allocation5 + $0x18] sm:$0xff]  ;;  %s92_s2 = sshll.u32 %s193_s1, 4  ;;  %s93_s2 = int_to_ptr.vmem [resolvable:$true] %s92_s2 }
  0x29   :  { %v47_v16 = vld [vmem:[#allocation2 + $0x10] sm:$0xff]  ;;  %v48_v17 = vld [vmem:[#allocation2 + $0x18] sm:$0xff]  ;;  %s159_s14 = scalar_lea.vmem %s93_s2, 512  ;;  %p164_p3 = scmp.lt.s32.totalorder %s93_s2, %s93_s2 }
  0x2a   :  { %p160_p2 = scmp.ne.s32.totalorder %s93_s2, %s159_s14  ;;  %p165_p4 = scmp.lt.s32.totalorder %s159_s14, %s159_s14 }
  0x2c   :  { %72 = vperm.xlu1 %113, %v44_v3   ;;  %56 = vperm.xlu0 %112, %v44_v3   ;;  %p166_p5 = por %p165_p4, %p164_p3 }
  0x2e   :  { %p167_p6 = pnand %p166_p5, %p160_p2 }
  0x30   :  { %114 = vset.pattern.permute.xlu0 %v191_v0 }
  0xa7   :  { %v69_v8 = vpop.permute.xlu1 %68  ;;  %v52_v9 = vpop.permute.xlu0 %51 }
  0xa8   :  { %v75_v10 = vmul.f32 %v69_v8, %v63_v4  ;;  %v76_v11 = vmul.f32 %v69_v8, %v64_v5  ;;  %v59_v12 = vmul.f32 %v52_v9, %v45_v6  ;;  %v60_v13 = vmul.f32 %v52_v9, %v46_v7 }
  0xaa   :  { %v79_v18 = vadd.f32 %v75_v10, %v59_v12  ;;  %v80_v19 = vadd.f32 %v76_v11, %v60_v13 }
  0xab   :  { %v73_v20 = vpop.permute.xlu1 %72  ;;  %v57_v21 = vpop.permute.xlu0 %56 }
  0xac   :  { %83 = vst [vmem:[#allocation7] sm:$0xff] %v79_v18  ;;  %84 = vst [vmem:[#allocation7 + $0x8] sm:$0xff] %v80_v19  ;;  %v77_v22 = vmul.f32 %v73_v20, %v65_v14  ;;  %v78_v23 = vmul.f32 %v73_v20, %v66_v15  ;;  %v61_v24 = vmul.f32 %v57_v21, %v47_v16 }
  0xad   :  { %v62_v25 = vmul.f32 %v57_v21, %v48_v17 }
  0xae   :  { %v81_v26 = vadd.f32 %v77_v22, %v61_v24 }
  0xaf   :  { %v82_v27 = vadd.f32 %v78_v23, %v62_v25 }
  0xb0   :  { %85 = vst [vmem:[#allocation7 + $0x10] sm:$0xff] %v81_v26 }
  0xb1   :  { %86 = vst [vmem:[#allocation7 + $0x18] sm:$0xff] %v82_v27 }
  0xb2   :  { %170 = shalt.err (!%p167_p6)
}
  0xb3   :  { %s171_s17 = scalar_lea.hbm %s268_s3, 512 }
  0xb4   :  { %p172_p7 = scmp.ne.s32.totalorder %s268_s3, %s171_s17  ;;  %p175_p8 = scmp.lt.u32.totalorder %s171_s17, %s268_s3 }
  0xb6   :  { %p177_p9 = pnand %p175_p8, %p172_p7 }
  0xb8   :  { %180 = shalt.err (!%p177_p9)
}
  0xb9   :  { %98 = dma.vmem_to_hbm [thread:$0]  %s93_s2, 512, %s268_s3, [#allocation4], %s188_s22, %s188_s22, %s189_s23  }
  0xba   :  { %185 = dma.done.wait [#allocation4], 512  }
  0xbb   :  { %186 = vsyncadd [#allocation4], 4294966784 }
  0xbc   :  { %102 = vsyncpa [#allocation3], 1 }
  0xbd   :  { %103 = vsyncpa [#allocation6], 1 }
  0xbe   :  { %104 = vsyncpa [#allocation4], 1 }

</bundles_post_ra>
